<compile_context>
chip_gen: v5e
topology: v5e:2x2
jax: 0.10.0
libtpu: 0.0.40
codegen_flags: <defaults>
</compile_context>

<pallas_src>
import jax
import jax.numpy as jnp
from jax.experimental import pallas as pl
from jax.experimental.pallas import tpu as pltpu


def _layernorm_kernel(x_ref, w_ref, b_ref, o_ref):
    # x_ref: (tile_rows, hidden); w_ref/b_ref: (1, hidden) already float32.
    x = x_ref[...].astype(jnp.float32)
    hidden = x.shape[-1]
    inv_h = 1.0 / hidden
    mean = jnp.sum(x, axis=-1, keepdims=True) * inv_h
    xc = x - mean
    # Biased variance (matches F.layer_norm). Two-pass form kept for numerics.
    var = jnp.sum(xc * xc, axis=-1, keepdims=True) * inv_h
    inv = jax.lax.rsqrt(var + 1e-5)
    y = xc * inv * w_ref[...] + b_ref[...]
    o_ref[...] = y.astype(o_ref.dtype)


def _choose_tile_rows(rows, hidden, itemsize):
    # Target ~2 MiB per block: input + output blocks, each double-buffered,
    # gives ~8 MiB of VMEM — fits the v5e 16 MiB scoped default (and v6e/v7x 32 MiB).
    target_bytes = 2 << 20
    tr = max(1, target_bytes // max(1, hidden * itemsize))
    tr = max(8, (tr // 8) * 8)            # keep a multiple of 8 sublanes (f32)
    rows_padded = ((rows + 7) // 8) * 8   # don't exceed the (padded) row count
    return min(tr, rows_padded)


def layer_norm_pallas(x, weight, bias=None):
    """x: (..., hidden). Normalizes over the last dim. weight/bias: (hidden,)."""
    orig_shape = x.shape
    hidden = orig_shape[-1]
    rows = 1
    for d in orig_shape[:-1]:
        rows *= d
    x2 = x.reshape(rows, hidden)

    if bias is None:
        bias = jnp.zeros((hidden,), dtype=jnp.float32)

    # Pre-cast params to f32 once in the wrapper (hoists the cast out of the
    # per-tile hot path); they stay resident across all grid steps.
    w2 = weight.astype(jnp.float32).reshape(1, hidden)
    b2 = bias.astype(jnp.float32).reshape(1, hidden)

    tile_rows = _choose_tile_rows(rows, hidden, x2.dtype.itemsize)
    grid = (pl.cdiv(rows, tile_rows),)

    out = pl.pallas_call(
        _layernorm_kernel,
        out_shape=jax.ShapeDtypeStruct((rows, hidden), x.dtype),
        grid=grid,
        in_specs=[
            pl.BlockSpec((tile_rows, hidden), lambda i: (i, 0)),  # x tile
            pl.BlockSpec((1, hidden), lambda i: (0, 0)),          # weight (resident)
            pl.BlockSpec((1, hidden), lambda i: (0, 0)),          # bias   (resident)
        ],
        out_specs=pl.BlockSpec((tile_rows, hidden), lambda i: (i, 0)),
        compiler_params=pltpu.CompilerParams(
            # Rows are independent -> 'parallel' lets v7x shard the grid across
            # both TensorCores; neutral on v5e/v6e.
            dimension_semantics=("parallel",),
        ),
    )(x2, w2, b2)

    return out.reshape(orig_shape)


def _reference_layernorm(x, weight, bias=None):
    mean = jnp.mean(x, axis=-1, keepdims=True)
    var = jnp.mean((x - mean) ** 2, axis=-1, keepdims=True)
    y = (x - mean) / jnp.sqrt(var + 1e-5) * weight
    if bias is not None:
        y = y + bias
    return y


if __name__ == "__main__":
    key = jax.random.PRNGKey(0)

    # Shapes consistent with the AGI module: hidden_size = 768 (Config),
    # small batch/seq. Config.bias = False -> no bias term.
    batch, seq, hidden = 2, 8, 768
    x = jax.random.normal(key, (batch, seq, hidden), dtype=jnp.float32)
    weight = jnp.ones((hidden,), dtype=jnp.float32)  # nn.Parameter(torch.ones(ndim))

    y = layer_norm_pallas(x, weight, bias=None)
    jax.block_until_ready(y)
    ref = _reference_layernorm(x, weight)
    assert jnp.allclose(y, ref, atol=1e-5, rtol=1e-5)

    # Second check that exercises multi-block tiling + a ragged last block
    # (rows not a multiple of TILE_ROWS).
    key2 = jax.random.PRNGKey(1)
    x_big = jax.random.normal(key2, (2, 1024, hidden), dtype=jnp.float32)
    y_big = layer_norm_pallas(x_big, weight, bias=None)
    jax.block_until_ready(y_big)
    ref_big = _reference_layernorm(x_big, weight)
    assert jnp.allclose(y_big, ref_big, atol=1e-5, rtol=1e-5)

    print("KERNEL_OK")
</pallas_src>

<mosaic_0001>
module attributes {stable_mosaic.version = 11 : i64} {
  func.func @_layernorm_kernel(%arg0: i32, %arg1: memref<16x768xf32, #tpu.memory_space<vmem>>, %arg2: memref<1x768xf32, #tpu.memory_space<vmem>>, %arg3: memref<1x768xf32, #tpu.memory_space<vmem>>, %arg4: memref<16x768xf32, #tpu.memory_space<vmem>>) attributes {dimension_semantics = [#tpu.dimension_semantics<parallel>], iteration_bounds = array<i64: 1>, scalar_prefetch = 0 : i64, scratch_operands = 0 : i64, tpu.core_type = #tpu.core_type<tc>, window_params = [{transform_indices = @transform_0, window_bounds = array<i64: 16, 768>}, {pipeline_mode = #tpu.pipeline_mode<synchronous>, transform_indices = @transform_1, window_bounds = array<i64: 1, 768>}, {pipeline_mode = #tpu.pipeline_mode<synchronous>, transform_indices = @transform_2, window_bounds = array<i64: 1, 768>}, {transform_indices = @transform_3, window_bounds = array<i64: 16, 768>}]} {
    %c0 = arith.constant 0 : index
    %c0_0 = arith.constant 0 : index
    %0 = vector.load %arg1[%c0, %c0_0] : memref<16x768xf32, #tpu.memory_space<vmem>>, vector<16x768xf32>
    %cst = arith.constant dense<0.000000e+00> : vector<16xf32>
    %1 = vector.multi_reduction <add>, %0, %cst [1] : vector<16x768xf32> to vector<16xf32>
    %2 = vector.shape_cast %1 : vector<16xf32> to vector<16x1xf32>
    %cst_1 = arith.constant 0.00130208337 : f32
    %3 = vector.broadcast %cst_1 : f32 to vector<16x1xf32>
    %4 = arith.mulf %2, %3 : vector<16x1xf32>
    %5 = vector.broadcast %4 : vector<16x1xf32> to vector<16x768xf32>
    %6 = arith.subf %0, %5 : vector<16x768xf32>
    %7 = arith.mulf %6, %6 : vector<16x768xf32>
    %cst_2 = arith.constant dense<0.000000e+00> : vector<16xf32>
    %8 = vector.multi_reduction <add>, %7, %cst_2 [1] : vector<16x768xf32> to vector<16xf32>
    %9 = vector.shape_cast %8 : vector<16xf32> to vector<16x1xf32>
    %cst_3 = arith.constant 0.00130208337 : f32
    %10 = vector.broadcast %cst_3 : f32 to vector<16x1xf32>
    %11 = arith.mulf %9, %10 : vector<16x1xf32>
    %cst_4 = arith.constant 9.99999974E-6 : f32
    %12 = vector.broadcast %cst_4 : f32 to vector<16x1xf32>
    %13 = arith.addf %11, %12 : vector<16x1xf32>
    %14 = math.rsqrt %13 : vector<16x1xf32>
    %15 = vector.broadcast %14 : vector<16x1xf32> to vector<16x768xf32>
    %16 = arith.mulf %6, %15 : vector<16x768xf32>
    %c0_5 = arith.constant 0 : index
    %c0_6 = arith.constant 0 : index
    %17 = vector.load %arg2[%c0_5, %c0_6] : memref<1x768xf32, #tpu.memory_space<vmem>>, vector<1x768xf32>
    %18 = vector.broadcast %17 : vector<1x768xf32> to vector<16x768xf32>
    %19 = arith.mulf %16, %18 : vector<16x768xf32>
    %c0_7 = arith.constant 0 : index
    %c0_8 = arith.constant 0 : index
    %20 = vector.load %arg3[%c0_7, %c0_8] : memref<1x768xf32, #tpu.memory_space<vmem>>, vector<1x768xf32>
    %21 = vector.broadcast %20 : vector<1x768xf32> to vector<16x768xf32>
    %22 = arith.addf %19, %21 : vector<16x768xf32>
    %c0_9 = arith.constant 0 : index
    %c0_10 = arith.constant 0 : index
    %23 = vector.load %arg4[%c0_9, %c0_10] : memref<16x768xf32, #tpu.memory_space<vmem>>, vector<16x768xf32>
    tpu.vector_store %arg4[%c0_9, %c0_10], %22 {strides = array<i32>} : memref<16x768xf32, #tpu.memory_space<vmem>>, vector<16x768xf32>,
    return
  }
  func.func @transform_0(%arg0: i32) -> (i32, i32) {
    %c0_i32 = arith.constant 0 : i32
    %c0_i32_0 = arith.constant 0 : i32
    return %arg0, %c0_i32 : i32, i32
  }
  func.func @transform_1(%arg0: i32) -> (i32, i32) {
    %c0_i32 = arith.constant 0 : i32
    %c0_i32_0 = arith.constant 0 : i32
    %c0_i32_1 = arith.constant 0 : i32
    return %c0_i32, %c0_i32_0 : i32, i32
  }
  func.func @transform_2(%arg0: i32) -> (i32, i32) {
    %c0_i32 = arith.constant 0 : i32
    %c0_i32_0 = arith.constant 0 : i32
    %c0_i32_1 = arith.constant 0 : i32
    return %c0_i32, %c0_i32_0 : i32, i32
  }
  func.func @transform_3(%arg0: i32) -> (i32, i32) {
    %c0_i32 = arith.constant 0 : i32
    %c0_i32_0 = arith.constant 0 : i32
    return %arg0, %c0_i32 : i32, i32
  }
}

</mosaic_0001>

<bundles_post_ra>
// kernel: tpu_custom_call.1
= control target key start
LH: loop header
LB: loop body
LE: loop exit
PB: predicated region body
PF: predicated region fallthrough
CT: control target
= control target key end

     0   :  { %8 = vsyncpa [#allocation3], 0  ;;  %s476_s0 = inlined_call_operand.hbm [shape: f32[16,768], index: 0, kind: input, shape index: {}]   ;;  %s477_s1 = inlined_call_operand.hbm [shape: f32[1,768], index: 1, kind: input, shape index: {}]   ;;  %s478_s2 = inlined_call_operand.hbm [shape: f32[1,768], index: 2, kind: input, shape index: {}]   ;;  %s479_s3 = inlined_call_operand.hbm [shape: f32[16,768], index: 3, kind: output, shape index: {}]  }
   0x1   :  { %9 = vsyncpa [#allocation6], 0  ;;  %s29_s14 = sshll.u32 %s477_s1, 4  ;;  %s30_s14 = int_to_ptr.hbm [resolvable:$true] %s29_s14 }
   0x2   :  { %10 = vsyncpa [#allocation4], 0  ;;  %s356_s15 = smov [#allocation5]   ;;  %s15_s19 = sshll.u32 %s476_s0, 4  ;;  %s16_s19 = int_to_ptr.hbm [resolvable:$true] %s15_s19 }
   0x3   :  { %s31_s16 = sshll.u32 %s356_s15, 4  ;;  %s357_s20 = smov [#allocation2]   ;;  %s32_s16 = int_to_ptr.vmem [resolvable:$true] %s31_s16 }
   0x4   :  { %34 = dma.hbm_to_vmem [thread:$0]  %s30_s14, 96, %s32_s16, [#allocation6]  }
   0x5   :  { %s17_s21 = sshll.u32 %s357_s20, 4  ;;  %s358_s22 = smov 768   ;;  %s18_s21 = int_to_ptr.vmem [resolvable:$true] %s17_s21 }
   0x6   :  { %s359_s23 = smov 48   ;;  %s40_s25 = sshll.u32 %s478_s2, 4  ;;  %s41_s25 = int_to_ptr.hbm [resolvable:$true] %s40_s25 }
   0x7   :  { %23 = dma.hbm_to_vmem [thread:$0]  %s16_s19, 1536, %s18_s21, [#allocation3], %s358_s22, %s358_s22, %s359_s23  }
   0x8   :  { %s360_s26 = smov [#allocation7]  }
   0x9   :  { %s42_s27 = sshll.u32 %s360_s26, 4  ;;  %s43_s27 = int_to_ptr.vmem [resolvable:$true] %s42_s27 }
   0xa   :  { %45 = dma.hbm_to_vmem [thread:$0]  %s41_s25, 96, %s43_s27, [#allocation6]  }
   0xb   :  { %350 = dma.done.wait [#allocation3], 1536  }
   0xc   :  { %351 = vsyncadd [#allocation3], 4294965760 }
   0xd   :  { %352 = dma.done.wait [#allocation6], 192  }
   0xe   :  { %353 = vsyncadd [#allocation6], 4294967104  ;;  %v58_v0 = vld [vmem:[#allocation2] sm:$0xff]  ;;  %v59_v1 = vld [vmem:[#allocation2 + $0x8] sm:$0xff]  ;;  %s361_s0 = smov [#allocation8]   ;;  %s230_s30 = sshll.u32 %s479_s3, 4  ;;  %s231_s30 = int_to_ptr.hbm [resolvable:$true] %s230_s30 }
   0xf   :  { %v60_v2 = vld [vmem:[#allocation2 + $0x10] sm:$0xff]  ;;  %v61_v3 = vld [vmem:[#allocation2 + $0x18] sm:$0xff]  ;;  %v70_v4 = vadd.f32 %v59_v1, %v58_v0  ;;  %v66_v7 = vld [vmem:[#allocation2 + $0x40] sm:$0xff]  ;;  %s228_s2 = sshll.u32 %s361_s0, 4  ;;  %s229_s2 = int_to_ptr.vmem [resolvable:$true] %s228_s2 }
  0x10   :  { %v64_v5 = vld [vmem:[#allocation2 + $0x30] sm:$0xff]  ;;  %v65_v6 = vld [vmem:[#allocation2 + $0x38] sm:$0xff]  ;;  %v62_v10 = vld [vmem:[#allocation2 + $0x20] sm:$0xff] }
  0x11   :  { %v71_v8 = vadd.f32 %v70_v4, %v60_v2  ;;  %v77_v9 = vadd.f32 %v65_v6, %v64_v5  ;;  %v67_v11 = vld [vmem:[#allocation2 + $0x48] sm:$0xff]  ;;  %v68_v17 = vld [vmem:[#allocation2 + $0x50] sm:$0xff]  ;;  %v69_v20 = vld [vmem:[#allocation2 + $0x58] sm:$0xff] }
  0x12   :  { %v63_v14 = vld [vmem:[#allocation2 + $0x28] sm:$0xff] }
  0x13   :  { %v72_v12 = vadd.f32 %v71_v8, %v61_v3  ;;  %v78_v13 = vadd.f32 %v77_v9, %v66_v7 }
  0x15   :  { %v73_v15 = vadd.f32 %v72_v12, %v62_v10  ;;  %v79_v16 = vadd.f32 %v78_v13, %v67_v11 }
  0x17   :  { %v74_v18 = vadd.f32 %v73_v15, %v63_v14  ;;  %v80_v19 = vadd.f32 %v79_v16, %v68_v17 }
  0x19   :  { %75 = vadd.xlane.f32.xlu0 %v74_v18  ;;  %v81_v21 = vadd.f32 %v80_v19, %v69_v20 }
  0x21   :  { %82 = vadd.xlane.f32.xlu0 %v81_v21 }
  0x8c   :  { %v76_v22 = vpop.xlane.xlu0 %75 }
  0x8d   :  { %v84_v23 = vmul.f32 0.0013020834, %v76_v22 }
  0x8f   :  { %v394_v24 = vsub.f32 %v58_v0, %v84_v23  ;;  %v396_v25 = vsub.f32 %v59_v1, %v84_v23  ;;  %v398_v26 = vsub.f32 %v60_v2, %v84_v23  ;;  %v400_v27 = vsub.f32 %v61_v3, %v84_v23 }
  0x90   :  { %v406_v30 = vsub.f32 %v62_v10, %v84_v23  ;;  %v410_v34 = vsub.f32 %v63_v14, %v84_v23 }
  0x91   :  { %v98_v28 = vmul.f32 %v394_v24, %v394_v24  ;;  %v99_v29 = vmul.f32 %v396_v25, %v396_v25  ;;  %v100_v31 = vmul.f32 %v398_v26, %v398_v26  ;;  %v101_v36 = vmul.f32 %v400_v27, %v400_v27 }
  0x92   :  { %v102_v38 = vmul.f32 %v406_v30, %v406_v30  ;;  %v103_v43 = vmul.f32 %v410_v34, %v410_v34 }
  0x93   :  { %v110_v32 = vadd.f32 %v99_v29, %v98_v28 }
  0x94   :  { %v83_v33 = vpop.xlane.xlu0 %82 }
  0x95   :  { %v85_v35 = vmul.f32 0.0013020834, %v83_v33  ;;  %v111_v37 = vadd.f32 %v110_v32, %v100_v31 }
  0x97   :  { %v112_v39 = vadd.f32 %v111_v37, %v101_v36  ;;  %v416_v40 = vsub.f32 %v64_v5, %v85_v35  ;;  %v418_v41 = vsub.f32 %v65_v6, %v85_v35  ;;  %v420_v42 = vsub.f32 %v66_v7, %v85_v35  ;;  %v442_v5 = vld [vmem:[#allocation5] sm:$0x3f]  ;;  %v444_v7 = vld [vmem:[#allocation7] sm:$0x3f] }
  0x98   :  { %v424_v45 = vsub.f32 %v67_v11, %v85_v35  ;;  %v430_v49 = vsub.f32 %v68_v17, %v85_v35  ;;  %v434_v52 = vsub.f32 %v69_v20, %v85_v35  ;;  %v162_v10 = vperm.slane %v442_v5, 0 }
  0x99   :  { %v113_v44 = vadd.f32 %v112_v39, %v102_v38  ;;  %v104_v46 = vmul.f32 %v416_v40, %v416_v40  ;;  %v105_v47 = vmul.f32 %v418_v41, %v418_v41  ;;  %v106_v50 = vmul.f32 %v420_v42, %v420_v42 }
  0x9a   :  { %v107_v53 = vmul.f32 %v424_v45, %v424_v45  ;;  %v108_v55 = vmul.f32 %v430_v49, %v430_v49  ;;  %v109_v57 = vmul.f32 %v434_v52, %v434_v52  ;;  %v163_v11 = vperm.slane %v442_v5, 1 }
  0x9b   :  { %v114_v48 = vadd.f32 %v113_v44, %v103_v43  ;;  %v117_v51 = vadd.f32 %v105_v47, %v104_v46  ;;  %v164_v12 = vperm.slane %v442_v5, 2  ;;  %v165_v13 = vperm.slane %v442_v5, 3 }
  0x9c   :  { %v166_v14 = vperm.slane %v442_v5, 4  ;;  %v167_v17 = vperm.slane %v442_v5, 5  ;;  %v188_v18 = vperm.slane %v444_v7, 0  ;;  %v189_v19 = vperm.slane %v444_v7, 1 }
  0x9d   :  { %115 = vadd.xlane.f32.xlu1 %v114_v48  ;;  %v118_v54 = vadd.f32 %v117_v51, %v106_v50  ;;  %v190_v20 = vperm.slane %v444_v7, 2  ;;  %v191_v21 = vperm.slane %v444_v7, 3  ;;  %v192_v22 = vperm.slane %v444_v7, 4 }
  0x9e   :  { %v193_v35 = vperm.slane %v444_v7, 5 }
  0x9f   :  { %v119_v56 = vadd.f32 %v118_v54, %v107_v53 }
  0xa1   :  { %v120_v58 = vadd.f32 %v119_v56, %v108_v55 }
  0xa3   :  { %v121_v59 = vadd.f32 %v120_v58, %v109_v57 }
  0xa5   :  { %122 = vadd.xlane.f32.xlu1 %v121_v59 }
 0x110   :  { %v116_v60 = vpop.xlane.xlu1 %115 }
 0x111   :  { %v124_v61 = vmul.f32 0.0013020834, %v116_v60 }
 0x113   :  { %v126_v62 = vadd.f32 1e-05, %v124_v61 }
 0x115   :  { %250 = vrsqrt.f32 %v126_v62  ;;  %vm134_vm1 = vweird.f32 %v126_v62 }
 0x118   :  { %v123_v63 = vpop.xlane.xlu1 %122 }
 0x119   :  { %v125_v0 = vmul.f32 0.0013020834, %v123_v63 }
 0x11b   :  { %v251_v1 = vpop.eup %250  ;;  %v127_v2 = vadd.f32 1e-05, %v125_v0 }
 0x11c   :  { %v129_v3 = vmul.f32 %v251_v1, %v126_v62  ;;  %vm135_vm0 = vweird.f32 %v251_v1 }
 0x11d   :  { %252 = vrsqrt.f32 %v127_v2  ;;  %vm136_vm2 = vmor %vm134_vm1, %vm135_vm0  ;;  %vm144_vm4 = vweird.f32 %v127_v2 }
 0x11e   :  { %v130_v4 = vmul.f32 %v251_v1, %v129_v3 }
 0x120   :  { %v131_v6 = vmul.f32 0.5, %v130_v4 }
 0x122   :  { %v132_v8 = vsub.f32 1.5, %v131_v6 }
 0x123   :  { %v253_v9 = vpop.eup %252 }
 0x124   :  { %v133_v15 = vmul.f32 %v251_v1, %v132_v8  ;;  %v139_v16 = vmul.f32 %v253_v9, %v127_v2  ;;  %vm145_vm3 = vweird.f32 %v253_v9 }
 0x125   :  { %vm146_vm5 = vmor %vm144_vm4, %vm145_vm3 }
 0x126   :  { %v137_v23 = vsel %vm136_vm2, %v251_v1, %v133_v15  ;;  %v140_v28 = vmul.f32 %v253_v9, %v139_v16 }
 0x127   :  { %v148_v29 = vmul.f32 %v137_v23, %v394_v24  ;;  %v149_v31 = vmul.f32 %v137_v23, %v396_v25  ;;  %v150_v32 = vmul.f32 %v137_v23, %v398_v26  ;;  %v151_v33 = vmul.f32 %v137_v23, %v400_v27 }
 0x128   :  { %v152_v36 = vmul.f32 %v137_v23, %v406_v30  ;;  %v153_v37 = vmul.f32 %v137_v23, %v410_v34  ;;  %v141_v38 = vmul.f32 0.5, %v140_v28 }
 0x129   :  { %v174_v39 = vmul.f32 %v162_v10, %v148_v29  ;;  %v175_v43 = vmul.f32 %v163_v11, %v149_v31  ;;  %v176_v44 = vmul.f32 %v164_v12, %v150_v32  ;;  %v177_v46 = vmul.f32 %v165_v13, %v151_v33 }
 0x12a   :  { %v178_v47 = vmul.f32 %v166_v14, %v152_v36  ;;  %v179_v48 = vmul.f32 %v167_v17, %v153_v37  ;;  %v142_v24 = vsub.f32 1.5, %v141_v38 }
 0x12b   :  { %v200_v25 = vadd.f32 %v188_v18, %v174_v39  ;;  %v201_v50 = vadd.f32 %v189_v19, %v175_v43  ;;  %v202_v26 = vadd.f32 %v190_v20, %v176_v44  ;;  %v203_v51 = vadd.f32 %v191_v21, %v177_v46 }
 0x12c   :  { %v143_v27 = vmul.f32 %v253_v9, %v142_v24  ;;  %v204_v53 = vadd.f32 %v192_v22, %v178_v47  ;;  %v205_v30 = vadd.f32 %v193_v35, %v179_v48 }
 0x12d   :  { %212 = vst [vmem:[#allocation8] sm:$0xff] %v200_v25 }
 0x12e   :  { %213 = vst [vmem:[#allocation8 + $0x8] sm:$0xff] %v201_v50  ;;  %v147_v34 = vsel %vm146_vm5, %v253_v9, %v143_v27 }
 0x12f   :  { %214 = vst [vmem:[#allocation8 + $0x10] sm:$0xff] %v202_v26  ;;  %v154_v54 = vmul.f32 %v147_v34, %v416_v40  ;;  %v155_v55 = vmul.f32 %v147_v34, %v418_v41  ;;  %v156_v56 = vmul.f32 %v147_v34, %v420_v42  ;;  %v157_v57 = vmul.f32 %v147_v34, %v424_v45 }
 0x130   :  { %215 = vst [vmem:[#allocation8 + $0x18] sm:$0xff] %v203_v51  ;;  %v158_v58 = vmul.f32 %v147_v34, %v430_v49  ;;  %v159_v59 = vmul.f32 %v147_v34, %v434_v52 }
 0x131   :  { %216 = vst [vmem:[#allocation8 + $0x20] sm:$0xff] %v204_v53  ;;  %v180_v60 = vmul.f32 %v162_v10, %v154_v54  ;;  %v181_v61 = vmul.f32 %v163_v11, %v155_v55  ;;  %v182_v62 = vmul.f32 %v164_v12, %v156_v56  ;;  %v183_v63 = vmul.f32 %v165_v13, %v157_v57 }
 0x132   :  { %217 = vst [vmem:[#allocation8 + $0x28] sm:$0xff] %v205_v30  ;;  %v184_v0 = vmul.f32 %v166_v14, %v158_v58  ;;  %v185_v1 = vmul.f32 %v167_v17, %v159_v59 }
 0x133   :  { %v206_v40 = vadd.f32 %v188_v18, %v180_v60  ;;  %v207_v2 = vadd.f32 %v189_v19, %v181_v61  ;;  %v208_v41 = vadd.f32 %v190_v20, %v182_v62  ;;  %v209_v3 = vadd.f32 %v191_v21, %v183_v63 }
 0x134   :  { %v210_v42 = vadd.f32 %v192_v22, %v184_v0  ;;  %v211_v45 = vadd.f32 %v193_v35, %v185_v1 }
 0x135   :  { %218 = vst [vmem:[#allocation8 + $0x30] sm:$0xff] %v206_v40 }
 0x136   :  { %219 = vst [vmem:[#allocation8 + $0x38] sm:$0xff] %v207_v2 }
 0x137   :  { %220 = vst [vmem:[#allocation8 + $0x40] sm:$0xff] %v208_v41 }
 0x138   :  { %221 = vst [vmem:[#allocation8 + $0x48] sm:$0xff] %v209_v3 }
 0x139   :  { %222 = vst [vmem:[#allocation8 + $0x50] sm:$0xff] %v210_v42 }
 0x13a   :  { %223 = vst [vmem:[#allocation8 + $0x58] sm:$0xff] %v211_v45 }
 0x13b   :  { %236 = dma.vmem_to_hbm [thread:$0]  %s229_s2, 1536, %s231_s30, [#allocation4], %s358_s22, %s358_s22, %s359_s23  }
 0x13c   :  { %354 = dma.done.wait [#allocation4], 1536  }
 0x13d   :  { %355 = vsyncadd [#allocation4], 4294965760 }
 0x13e   :  { %241 = vsyncpa [#allocation3], 1 }
 0x13f   :  { %242 = vsyncpa [#allocation6], 1 }
 0x140   :  { %243 = vsyncpa [#allocation4], 1 }

</bundles_post_ra>
